<compile_context>
chip_gen: v5e
topology: v5e:2x2
jax: 0.10.0
libtpu: 0.0.40
codegen_flags: <defaults>
</compile_context>

<pallas_src>
import functools

import jax
import jax.numpy as jnp
from jax.experimental import pallas as pl
from jax.experimental.pallas import tpu as pltpu


def _atan_f32(x):
    """float32 arctan via Cephes-style range reduction + minimax poly.

    Mosaic has no native atan lowering, so we build it from supported VPU/EUP ops.
    Divides go through the EUP approximate reciprocal (free slot vs. VALU).
    """
    sign = jnp.where(x >= 0.0, 1.0, -1.0).astype(jnp.float32)
    ax = jnp.abs(x)
    tan3pi8 = 2.414213562373095
    tanpi8 = 0.4142135623730950
    big = ax > tan3pi8
    mid = jnp.logical_and(ax > tanpi8, jnp.logical_not(big))
    safe_ax = jnp.maximum(ax, 1e-30)
    inv_ax = pl.reciprocal(safe_ax, approx=True)
    inv_ax1 = pl.reciprocal(ax + 1.0, approx=True)
    xr = jnp.where(big, -inv_ax,
                   jnp.where(mid, (ax - 1.0) * inv_ax1, ax))
    y0 = jnp.where(big, jnp.float32(jnp.pi / 2),
                   jnp.where(mid, jnp.float32(jnp.pi / 4), jnp.float32(0.0)))
    z = xr * xr
    poly = (((8.05374449538e-2 * z - 1.38776856032e-1) * z
             + 1.99777106478e-1) * z - 3.33329491539e-1) * z * xr + xr
    return sign * (y0 + poly)


def _pick_hw_tile(hw, c, itemsize):
    """Largest HW tile that divides HW, is a multiple of 128 (or == HW), and keeps a
    (C, hw_tile) block around ~1 MiB so double-buffered VMEM stays well inside v7x's
    64 MiB physical / 32 MiB default scoped limit (v5e/v6e have more headroom)."""
    target = 1 << 20
    if hw * c * itemsize <= 2 * target:
        return hw
    max_tile = max(128, (target // (c * itemsize)) // 128 * 128)
    t = min(max_tile, (hw // 128) * 128)
    while t >= 128:
        if hw % t == 0:
            return t
        t -= 128
    return hw   # no 128-multiple divisor: fall back to full-extent block (still valid)


def _yolo_decode_kernel(anchor_ref, p_ref, io_ref, *, nx, stride, cfm1, nc, arc):
    """Decode one (batch, anchor, hw-tile) block.

    anchor_ref: SMEM (na, 3) = (anchor_w, anchor_h / cf, anchor_angle)
    p_ref     : VMEM (C, hw_tile) raw predictions (channel-major, HW on lanes)
    io_ref    : VMEM (C, hw_tile) decoded predictions
    """
    a = pl.program_id(1)          # anchor index
    t = pl.program_id(2)          # HW-tile index
    hw_tile = p_ref.shape[-1]
    C = nc + 6
    odt = io_ref.dtype

    aw = anchor_ref[a, 0]         # anchor_w            (== anchor_vec_w * stride)
    ah = anchor_ref[a, 1]         # anchor_h / cf       (== anchor_vec_h * stride / cf)
    at = anchor_ref[a, 2]         # anchor angle offset (radians)

    # Grid-cell offsets for this HW tile, generated in-kernel (no DMA'd grid tensor).
    # Float floor-division is exact for flat < 2**24 and nx < 1024 (any real YOLO head).
    flat = (t * hw_tile
            + jax.lax.broadcasted_iota(jnp.int32, (1, hw_tile), 1)).astype(jnp.float32)
    nxf = jnp.float32(nx)
    yo = jnp.floor(flat / nxf)
    xo = flat - yo * nxf

    # xy: sigmoid + cell offset, scaled by stride (full-lane row stores)
    x0 = p_ref[0:1, :].astype(jnp.float32)
    x1 = p_ref[1:2, :].astype(jnp.float32)
    io_ref[0:1, :] = ((jax.nn.sigmoid(x0) + xo) * stride).astype(odt)
    io_ref[1:2, :] = ((jax.nn.sigmoid(x1) + yo) * stride).astype(odt)

    # wh: exp * anchor, with stride and the context-factor adjustment pre-folded
    w0 = jnp.exp(p_ref[2:3, :].astype(jnp.float32)) * aw
    h = jnp.exp(p_ref[3:4, :].astype(jnp.float32)) * ah
    io_ref[2:3, :] = (w0 - h * cfm1).astype(odt)
    io_ref[3:4, :] = h.astype(odt)

    # angle: atan + anchor angle
    io_ref[4:5, :] = (_atan_f32(p_ref[4:5, :].astype(jnp.float32)) + at).astype(odt)

    # objectness / class tail — arc is a compile-time choice
    if 'default' in arc:
        io_ref[5:C, :] = jax.nn.sigmoid(p_ref[5:C, :].astype(jnp.float32)).astype(odt)
    elif 'BCE' in arc:
        io_ref[6:C, :] = jax.nn.sigmoid(p_ref[6:C, :].astype(jnp.float32)).astype(odt)
        io_ref[5:6, :] = jnp.ones((1, hw_tile), odt)
    else:
        # TODO(synk): the 'CE' arc in the reference assigns a (C-4)-wide softmax into a
        # (C-5)-wide slice (raises in PyTorch); logits are passed through unchanged.
        io_ref[5:C, :] = p_ref[5:C, :]

    if nc == 1:
        io_ref[6:7, :] = jnp.ones((1, hw_tile), odt)


class YOLOLayerPallas:
    """JAX/Pallas port of YOLOLayer (inference). anchors: (na, 3) = (w, h, angle)."""

    def __init__(self, anchors, nc, yolo_index, arc, hyp):
        self.anchors = jnp.asarray(anchors, dtype=jnp.float32)   # (na, 3)
        self.na = len(anchors)
        self.nc = nc
        self.arc = arc
        self.hyp = hyp
        self.yolo_index = yolo_index
        self.training = False

    def __call__(self, p, img_size):
        bs = p.shape[0]
        ny, nx = p.shape[-2], p.shape[-1]
        C = self.nc + 6
        hw = ny * nx
        stride = float(img_size) / float(max(nx, ny))
        cf = float(self.hyp['context_factor'])

        # Raw permuted output (second return value / training output) — XLA glue only;
        # the decode kernel never reads this transposed copy.
        p5 = p.reshape(bs, self.na, C, ny, nx)
        p_perm = jnp.transpose(p5, (0, 1, 3, 4, 2))
        if self.training:
            return p_perm

        # Per-anchor constants with stride and 1/context_factor folded in (SMEM table).
        anchor_eff = jnp.stack(
            [self.anchors[:, 0],            # anchor_w  (= anchor_vec_w * stride)
             self.anchors[:, 1] / cf,       # anchor_h / cf
             self.anchors[:, 2]],           # angle offset (radians)
            axis=-1).astype(jnp.float32)

        itemsize = jnp.dtype(p.dtype).itemsize
        hw_tile = _pick_hw_tile(hw, C, itemsize)
        n_t = hw // hw_tile

        # Channel-major kernel input: pure view of NCHW, no transpose / HBM round trip.
        p_cm = p.reshape(bs, self.na, C, hw)

        kernel = functools.partial(
            _yolo_decode_kernel,
            nx=nx, stride=stride, cfm1=cf - 1.0, nc=self.nc, arc=self.arc)

        io_cm = pl.pallas_call(
            kernel,
            out_shape=jax.ShapeDtypeStruct((bs, self.na, C, hw), p.dtype),
            grid=(bs, self.na, n_t),
            in_specs=[
                pl.BlockSpec(memory_space=pltpu.MemorySpace.SMEM),        # anchors
                pl.BlockSpec((None, None, C, hw_tile),
                             lambda b, a, t: (b, a, 0, t)),               # predictions
            ],
            out_specs=pl.BlockSpec((None, None, C, hw_tile),
                                   lambda b, a, t: (b, a, 0, t)),
            compiler_params=pltpu.CompilerParams(
                dimension_semantics=("parallel", "parallel", "parallel")),
        )(anchor_eff, p_cm)

        # Wrapper-side layout plumbing back to the PyTorch output convention.
        io = jnp.transpose(io_cm.reshape(bs, self.na, C, ny, nx),
                           (0, 1, 3, 4, 2)).reshape(bs, -1, C)
        return io, p_perm


# ---------------------------- pure-JAX reference -------------------------------
def _reference(p, img_size, anchors, nc, hyp, arc='default'):
    bs, _, ny, nx = p.shape
    na = anchors.shape[0]
    C = nc + 6
    stride = float(img_size) / float(max(nx, ny))
    yv, xv = jnp.meshgrid(jnp.arange(ny), jnp.arange(nx), indexing='ij')
    grid_xy = jnp.stack([xv, yv], -1).astype(jnp.float32).reshape(1, 1, ny, nx, 2)
    anchor_wh = anchors.at[:, :2].divide(stride).reshape(1, na, 1, 1, 3)

    pp = jnp.transpose(p.reshape(bs, na, C, ny, nx), (0, 1, 3, 4, 2))
    io = pp.astype(jnp.float32)
    xy = (jax.nn.sigmoid(io[..., 0:2]) + grid_xy) * stride
    wh = jnp.exp(io[..., 2:4]) * anchor_wh[..., :2] * stride
    ang = jnp.arctan(io[..., 4:5]) + anchor_wh[..., 2:3]
    cf = hyp['context_factor']
    h = wh[..., 1:2] / cf
    w = wh[..., 0:1] - h * (cf - 1.0)
    if 'default' in arc:
        tail = jax.nn.sigmoid(io[..., 5:])
    elif 'BCE' in arc:
        tail = jnp.concatenate(
            [jnp.ones_like(io[..., 5:6]), jax.nn.sigmoid(io[..., 6:])], axis=-1)
    else:
        tail = io[..., 5:]
    out = jnp.concatenate([xy, w, h, ang, tail], axis=-1)
    if nc == 1:
        out = out.at[..., 6].set(1.0)
    return out.reshape(bs, -1, C).astype(p.dtype), pp


if __name__ == "__main__":
    key = jax.random.PRNGKey(0)

    anchors = [(10.0, 13.0, 0.1), (33.0, 23.0, -0.2), (30.0, 61.0, 0.3)]
    hyp = {'context_factor': 1.5}
    img_size = 256
    bs, ny, nx = 2, 16, 16

    for nc, arc in [(2, 'default'), (1, 'default'), (3, 'BCE')]:
        layer = YOLOLayerPallas(anchors, nc=nc, yolo_index=0, arc=arc, hyp=hyp)
        na, C = layer.na, nc + 6

        key, sub = jax.random.split(key)
        p = 0.5 * jax.random.normal(sub, (bs, na * C, ny, nx), dtype=jnp.float32)

        io_out, p_out = layer(p, img_size)
        io_out = jax.block_until_ready(io_out)
        p_out = jax.block_until_ready(p_out)

        io_ref, p_ref_out = _reference(p, img_size, layer.anchors, nc, hyp, arc)

        assert io_out.shape == (bs, na * ny * nx, C)
        assert p_out.shape == (bs, na, ny, nx, C)
        assert jnp.allclose(p_out, p_ref_out), \
            f"raw permuted output mismatch (nc={nc}, arc={arc})"
        assert jnp.allclose(io_out, io_ref, atol=1e-3, rtol=1e-3), \
            f"decoded output mismatch (nc={nc}, arc={arc})"

    print("KERNEL_OK")
</pallas_src>

<mosaic_0001>
module attributes {stable_mosaic.version = 11 : i64} {
  func.func @_yolo_decode_kernel(%arg0: i32, %arg1: i32, %arg2: i32, %arg3: memref<3x3xf32, #tpu.memory_space<smem>>, %arg4: memref<1x1x8x256xf32, #tpu.memory_space<vmem>>, %arg5: memref<1x1x8x256xf32, #tpu.memory_space<vmem>>) attributes {dimension_semantics = [#tpu.dimension_semantics<parallel>, #tpu.dimension_semantics<parallel>, #tpu.dimension_semantics<parallel>], iteration_bounds = array<i64: 2, 3, 1>, scalar_prefetch = 0 : i64, scratch_operands = 0 : i64, tpu.core_type = #tpu.core_type<tc>, window_params = [{transform_indices = @transform_0, window_bounds = array<i64: 3, 3>}, {transform_indices = @transform_1, window_bounds = array<i64: 1, 1, 8, 256>}, {transform_indices = @transform_2, window_bounds = array<i64: 1, 1, 8, 256>}]} {
    %0 = arith.index_cast %arg1 : i32 to index
    %c0 = arith.constant 0 : index
    %1 = memref.load %arg3[%0, %c0] : memref<3x3xf32, #tpu.memory_space<smem>>
    %2 = arith.index_cast %arg1 : i32 to index
    %c1 = arith.constant 1 : index
    %3 = memref.load %arg3[%2, %c1] : memref<3x3xf32, #tpu.memory_space<smem>>
    %4 = arith.index_cast %arg1 : i32 to index
    %c2 = arith.constant 2 : index
    %5 = memref.load %arg3[%4, %c2] : memref<3x3xf32, #tpu.memory_space<smem>>
    %c256_i32 = arith.constant 256 : i32
    %6 = arith.muli %arg2, %c256_i32 : i32
    %7 = tpu.iota {dimensions = array<i32: 1>} : vector<1x256xi32>
    %8 = vector.broadcast %6 : i32 to vector<1x256xi32>
    %9 = arith.addi %8, %7 : vector<1x256xi32>
    %10 = arith.sitofp %9 : vector<1x256xi32> to vector<1x256xf32>
    %cst = arith.constant 1.600000e+01 : f32
    %11 = vector.broadcast %cst : f32 to vector<1x256xf32>
    %12 = arith.divf %10, %11 : vector<1x256xf32>
    %13 = math.floor %12 : vector<1x256xf32>
    %cst_0 = arith.constant 1.600000e+01 : f32
    %14 = vector.broadcast %cst_0 : f32 to vector<1x256xf32>
    %15 = arith.mulf %13, %14 : vector<1x256xf32>
    %16 = arith.subf %10, %15 : vector<1x256xf32>
    %c0_1 = arith.constant 0 : index
    %c0_2 = arith.constant 0 : index
    %c0_3 = arith.constant 0 : index
    %c0_4 = arith.constant 0 : index
    %17 = vector.load %arg4[%c0_1, %c0_2, %c0_3, %c0_4] : memref<1x1x8x256xf32, #tpu.memory_space<vmem>>, vector<1x1x1x256xf32>
    %18 = vector.shape_cast %17 : vector<1x1x1x256xf32> to vector<1x256xf32>
    %c0_5 = arith.constant 0 : index
    %c0_6 = arith.constant 0 : index
    %c1_7 = arith.constant 1 : index
    %c0_8 = arith.constant 0 : index
    %19 = vector.load %arg4[%c0_5, %c0_6, %c1_7, %c0_8] : memref<1x1x8x256xf32, #tpu.memory_space<vmem>>, vector<1x1x1x256xf32>
    %20 = vector.shape_cast %19 : vector<1x1x1x256xf32> to vector<1x256xf32>
    %21 = arith.negf %18 : vector<1x256xf32>
    %22 = math.exp %21 : vector<1x256xf32>
    %cst_9 = arith.constant 1.000000e+00 : f32
    %23 = vector.broadcast %cst_9 : f32 to vector<1x256xf32>
    %24 = arith.addf %23, %22 : vector<1x256xf32>
    %25 = arith.divf %23, %24 : vector<1x256xf32>
    %26 = arith.addf %25, %16 : vector<1x256xf32>
    %cst_10 = arith.constant 1.600000e+01 : f32
    %27 = vector.broadcast %cst_10 : f32 to vector<1x256xf32>
    %28 = arith.mulf %26, %27 : vector<1x256xf32>
    %c0_11 = arith.constant 0 : index
    %c0_12 = arith.constant 0 : index
    %c0_13 = arith.constant 0 : index
    %c0_14 = arith.constant 0 : index
    %29 = vector.load %arg5[%c0_11, %c0_12, %c0_13, %c0_14] : memref<1x1x8x256xf32, #tpu.memory_space<vmem>>, vector<1x1x1x256xf32>
    %30 = vector.shape_cast %29 : vector<1x1x1x256xf32> to vector<1x256xf32>
    %31 = vector.shape_cast %28 : vector<1x256xf32> to vector<1x1x1x256xf32>
    tpu.vector_store %arg5[%c0_11, %c0_12, %c0_13, %c0_14], %31 {strides = array<i32>} : memref<1x1x8x256xf32, #tpu.memory_space<vmem>>, vector<1x1x1x256xf32>,
    %32 = arith.negf %20 : vector<1x256xf32>
    %33 = math.exp %32 : vector<1x256xf32>
    %cst_15 = arith.constant 1.000000e+00 : f32
    %34 = vector.broadcast %cst_15 : f32 to vector<1x256xf32>
    %35 = arith.addf %34, %33 : vector<1x256xf32>
    %36 = arith.divf %34, %35 : vector<1x256xf32>
    %37 = arith.addf %36, %13 : vector<1x256xf32>
    %cst_16 = arith.constant 1.600000e+01 : f32
    %38 = vector.broadcast %cst_16 : f32 to vector<1x256xf32>
    %39 = arith.mulf %37, %38 : vector<1x256xf32>
    %c0_17 = arith.constant 0 : index
    %c0_18 = arith.constant 0 : index
    %c1_19 = arith.constant 1 : index
    %c0_20 = arith.constant 0 : index
    %40 = vector.load %arg5[%c0_17, %c0_18, %c1_19, %c0_20] : memref<1x1x8x256xf32, #tpu.memory_space<vmem>>, vector<1x1x1x256xf32>
    %41 = vector.shape_cast %40 : vector<1x1x1x256xf32> to vector<1x256xf32>
    %42 = vector.shape_cast %39 : vector<1x256xf32> to vector<1x1x1x256xf32>
    tpu.vector_store %arg5[%c0_17, %c0_18, %c1_19, %c0_20], %42 {strides = array<i32>} : memref<1x1x8x256xf32, #tpu.memory_space<vmem>>, vector<1x1x1x256xf32>,
    %c0_21 = arith.constant 0 : index
    %c0_22 = arith.constant 0 : index
    %c2_23 = arith.constant 2 : index
    %c0_24 = arith.constant 0 : index
    %43 = vector.load %arg4[%c0_21, %c0_22, %c2_23, %c0_24] : memref<1x1x8x256xf32, #tpu.memory_space<vmem>>, vector<1x1x1x256xf32>
    %44 = vector.shape_cast %43 : vector<1x1x1x256xf32> to vector<1x256xf32>
    %45 = math.exp %44 : vector<1x256xf32>
    %46 = vector.broadcast %1 : f32 to vector<1x256xf32>
    %47 = arith.mulf %45, %46 : vector<1x256xf32>
    %c0_25 = arith.constant 0 : index
    %c0_26 = arith.constant 0 : index
    %c3 = arith.constant 3 : index
    %c0_27 = arith.constant 0 : index
    %48 = vector.load %arg4[%c0_25, %c0_26, %c3, %c0_27] : memref<1x1x8x256xf32, #tpu.memory_space<vmem>>, vector<1x1x1x256xf32>
    %49 = vector.shape_cast %48 : vector<1x1x1x256xf32> to vector<1x256xf32>
    %50 = math.exp %49 : vector<1x256xf32>
    %51 = vector.broadcast %3 : f32 to vector<1x256xf32>
    %52 = arith.mulf %50, %51 : vector<1x256xf32>
    %cst_28 = arith.constant 5.000000e-01 : f32
    %53 = vector.broadcast %cst_28 : f32 to vector<1x256xf32>
    %54 = arith.mulf %52, %53 : vector<1x256xf32>
    %55 = arith.subf %47, %54 : vector<1x256xf32>
    %c0_29 = arith.constant 0 : index
    %c0_30 = arith.constant 0 : index
    %c2_31 = arith.constant 2 : index
    %c0_32 = arith.constant 0 : index
    %56 = vector.load %arg5[%c0_29, %c0_30, %c2_31, %c0_32] : memref<1x1x8x256xf32, #tpu.memory_space<vmem>>, vector<1x1x1x256xf32>
    %57 = vector.shape_cast %56 : vector<1x1x1x256xf32> to vector<1x256xf32>
    %58 = vector.shape_cast %55 : vector<1x256xf32> to vector<1x1x1x256xf32>
    tpu.vector_store %arg5[%c0_29, %c0_30, %c2_31, %c0_32], %58 {strides = array<i32>} : memref<1x1x8x256xf32, #tpu.memory_space<vmem>>, vector<1x1x1x256xf32>,
    %c0_33 = arith.constant 0 : index
    %c0_34 = arith.constant 0 : index
    %c3_35 = arith.constant 3 : index
    %c0_36 = arith.constant 0 : index
    %59 = vector.load %arg5[%c0_33, %c0_34, %c3_35, %c0_36] : memref<1x1x8x256xf32, #tpu.memory_space<vmem>>, vector<1x1x1x256xf32>
    %60 = vector.shape_cast %59 : vector<1x1x1x256xf32> to vector<1x256xf32>
    %61 = vector.shape_cast %52 : vector<1x256xf32> to vector<1x1x1x256xf32>
    tpu.vector_store %arg5[%c0_33, %c0_34, %c3_35, %c0_36], %61 {strides = array<i32>} : memref<1x1x8x256xf32, #tpu.memory_space<vmem>>, vector<1x1x1x256xf32>,
    %c0_37 = arith.constant 0 : index
    %c0_38 = arith.constant 0 : index
    %c4 = arith.constant 4 : index
    %c0_39 = arith.constant 0 : index
    %62 = vector.load %arg4[%c0_37, %c0_38, %c4, %c0_39] : memref<1x1x8x256xf32, #tpu.memory_space<vmem>>, vector<1x1x1x256xf32>
    %63 = vector.shape_cast %62 : vector<1x1x1x256xf32> to vector<1x256xf32>
    %cst_40 = arith.constant 0.000000e+00 : f32
    %64 = vector.broadcast %cst_40 : f32 to vector<1x256xf32>
    %65 = arith.cmpf oge, %63, %64 : vector<1x256xf32>
    %cst_41 = arith.constant 1.000000e+00 : f32
    %cst_42 = arith.constant -1.000000e+00 : f32
    %66 = vector.broadcast %cst_41 : f32 to vector<1x256xf32>
    %67 = vector.broadcast %cst_42 : f32 to vector<1x256xf32>
    %68 = arith.select %65, %66, %67 : vector<1x256xi1>, vector<1x256xf32>
    %69 = math.absf %63 : vector<1x256xf32>
    %cst_43 = arith.constant 2.41421366 : f32
    %70 = vector.broadcast %cst_43 : f32 to vector<1x256xf32>
    %71 = arith.cmpf ogt, %69, %70 : vector<1x256xf32>
    %cst_44 = arith.constant 0.414213568 : f32
    %72 = vector.broadcast %cst_44 : f32 to vector<1x256xf32>
    %73 = arith.cmpf ogt, %69, %72 : vector<1x256xf32>
    %cst_45 = arith.constant dense<true> : vector<1x256xi1>
    %74 = arith.xori %71, %cst_45 : vector<1x256xi1>
    %75 = arith.andi %73, %74 : vector<1x256xi1>
    %cst_46 = arith.constant 1.000000e-30 : f32
    %76 = vector.broadcast %cst_46 : f32 to vector<1x256xf32>
    %77 = arith.maximumf %69, %76 : vector<1x256xf32>
    %78 = tpu.reciprocal %77 {approx = true} : vector<1x256xf32> -> vector<1x256xf32>
    %cst_47 = arith.constant 1.000000e+00 : f32
    %79 = vector.broadcast %cst_47 : f32 to vector<1x256xf32>
    %80 = arith.addf %69, %79 : vector<1x256xf32>
    %81 = tpu.reciprocal %80 {approx = true} : vector<1x256xf32> -> vector<1x256xf32>
    %cst_48 = arith.constant 0.000000e+00 : f32
    %82 = vector.broadcast %cst_48 : f32 to vector<1x256xf32>
    %83 = arith.subf %82, %78 : vector<1x256xf32>
    %cst_49 = arith.constant 1.000000e+00 : f32
    %84 = vector.broadcast %cst_49 : f32 to vector<1x256xf32>
    %85 = arith.subf %69, %84 : vector<1x256xf32>
    %86 = arith.mulf %85, %81 : vector<1x256xf32>
    %87 = arith.select %75, %86, %69 : vector<1x256xi1>, vector<1x256xf32>
    %88 = arith.select %71, %83, %87 : vector<1x256xi1>, vector<1x256xf32>
    %cst_50 = arith.constant 0.785398185 : f32
    %cst_51 = arith.constant 0.000000e+00 : f32
    %89 = vector.broadcast %cst_50 : f32 to vector<1x256xf32>
    %90 = vector.broadcast %cst_51 : f32 to vector<1x256xf32>
    %91 = arith.select %75, %89, %90 : vector<1x256xi1>, vector<1x256xf32>
    %cst_52 = arith.constant 1.57079637 : f32
    %92 = vector.broadcast %cst_52 : f32 to vector<1x256xf32>
    %93 = arith.select %71, %92, %91 : vector<1x256xi1>, vector<1x256xf32>
    %94 = arith.mulf %88, %88 : vector<1x256xf32>
    %cst_53 = arith.constant 0.0805374458 : f32
    %95 = vector.broadcast %cst_53 : f32 to vector<1x256xf32>
    %96 = arith.mulf %95, %94 : vector<1x256xf32>
    %cst_54 = arith.constant 0.138776854 : f32
    %97 = vector.broadcast %cst_54 : f32 to vector<1x256xf32>
    %98 = arith.subf %96, %97 : vector<1x256xf32>
    %99 = arith.mulf %98, %94 : vector<1x256xf32>
    %cst_55 = arith.constant 0.199777111 : f32
    %100 = vector.broadcast %cst_55 : f32 to vector<1x256xf32>
    %101 = arith.addf %99, %100 : vector<1x256xf32>
    %102 = arith.mulf %101, %94 : vector<1x256xf32>
    %cst_56 = arith.constant 0.333329499 : f32
    %103 = vector.broadcast %cst_56 : f32 to vector<1x256xf32>
    %104 = arith.subf %102, %103 : vector<1x256xf32>
    %105 = arith.mulf %104, %94 : vector<1x256xf32>
    %106 = arith.mulf %105, %88 : vector<1x256xf32>
    %107 = arith.addf %106, %88 : vector<1x256xf32>
    %108 = arith.addf %93, %107 : vector<1x256xf32>
    %109 = arith.mulf %68, %108 : vector<1x256xf32>
    %110 = vector.broadcast %5 : f32 to vector<1x256xf32>
    %111 = arith.addf %109, %110 : vector<1x256xf32>
    %c0_57 = arith.constant 0 : index
    %c0_58 = arith.constant 0 : index
    %c4_59 = arith.constant 4 : index
    %c0_60 = arith.constant 0 : index
    %112 = vector.load %arg5[%c0_57, %c0_58, %c4_59, %c0_60] : memref<1x1x8x256xf32, #tpu.memory_space<vmem>>, vector<1x1x1x256xf32>
    %113 = vector.shape_cast %112 : vector<1x1x1x256xf32> to vector<1x256xf32>
    %114 = vector.shape_cast %111 : vector<1x256xf32> to vector<1x1x1x256xf32>
    tpu.vector_store %arg5[%c0_57, %c0_58, %c4_59, %c0_60], %114 {strides = array<i32>} : memref<1x1x8x256xf32, #tpu.memory_space<vmem>>, vector<1x1x1x256xf32>,
    %c0_61 = arith.constant 0 : index
    %c0_62 = arith.constant 0 : index
    %c5 = arith.constant 5 : index
    %c0_63 = arith.constant 0 : index
    %115 = vector.load %arg4[%c0_61, %c0_62, %c5, %c0_63] : memref<1x1x8x256xf32, #tpu.memory_space<vmem>>, vector<1x1x3x256xf32>
    %116 = vector.shape_cast %115 : vector<1x1x3x256xf32> to vector<3x256xf32>
    %117 = arith.negf %116 : vector<3x256xf32>
    %118 = math.exp %117 : vector<3x256xf32>
    %cst_64 = arith.constant 1.000000e+00 : f32
    %119 = vector.broadcast %cst_64 : f32 to vector<3x256xf32>
    %120 = arith.addf %119, %118 : vector<3x256xf32>
    %121 = arith.divf %119, %120 : vector<3x256xf32>
    %c0_65 = arith.constant 0 : index
    %c0_66 = arith.constant 0 : index
    %c5_67 = arith.constant 5 : index
    %c0_68 = arith.constant 0 : index
    %122 = vector.load %arg5[%c0_65, %c0_66, %c5_67, %c0_68] : memref<1x1x8x256xf32, #tpu.memory_space<vmem>>, vector<1x1x3x256xf32>
    %123 = vector.shape_cast %122 : vector<1x1x3x256xf32> to vector<3x256xf32>
    %124 = vector.shape_cast %121 : vector<3x256xf32> to vector<1x1x3x256xf32>
    tpu.vector_store %arg5[%c0_65, %c0_66, %c5_67, %c0_68], %124 {strides = array<i32>} : memref<1x1x8x256xf32, #tpu.memory_space<vmem>>, vector<1x1x3x256xf32>,
    return
  }
  func.func @transform_0(%arg0: i32, %arg1: i32, %arg2: i32) -> (i32, i32) {
    %c0_i32 = arith.constant 0 : i32
    %c0_i32_0 = arith.constant 0 : i32
    %c0_i32_1 = arith.constant 0 : i32
    return %c0_i32, %c0_i32_0 : i32, i32
  }
  func.func @transform_1(%arg0: i32, %arg1: i32, %arg2: i32) -> (i32, i32, i32, i32) {
    %c0_i32 = arith.constant 0 : i32
    %c0_i32_0 = arith.constant 0 : i32
    return %arg0, %arg1, %c0_i32, %arg2 : i32, i32, i32, i32
  }
  func.func @transform_2(%arg0: i32, %arg1: i32, %arg2: i32) -> (i32, i32, i32, i32) {
    %c0_i32 = arith.constant 0 : i32
    %c0_i32_0 = arith.constant 0 : i32
    return %arg0, %arg1, %c0_i32, %arg2 : i32, i32, i32, i32
  }
}

</mosaic_0001>

<bundles_post_ra>
// kernel: tpu_custom_call.1
= control target key start
LH: loop header
LB: loop body
LE: loop exit
PB: predicated region body
PF: predicated region fallthrough
CT: control target
= control target key end

     0   :  { %s1163_s0 = inlined_call_operand.hbm [shape: f32[3,3], index: 0, kind: input, shape index: {}]   ;;  %s1164_s1 = inlined_call_operand.hbm [shape: f32[2,3,8,256], index: 1, kind: input, shape index: {}]   ;;  %s1165_s2 = inlined_call_operand.hbm [shape: f32[2,3,8,256], index: 2, kind: output, shape index: {}]  }
   0x1   :  { %1170 = sst [smem:[#allocation15_spill]] %s1163_s0 }
   0x2   :  { %7 = vsyncpa [#allocation5], 0 }
   0x3   :  { %8 = vsyncpa [#allocation3], 0 }
   0x4   :  { %10 = vsyncpa [#allocation3 + $0x1], 0 }
   0x5   :  { %11 = vsyncpa [#allocation4], 0 }
   0x6   :  { %13 = vsyncpa [#allocation4 + $0x1], 0  ;;  %s853_s9 = smov 0   ;;  %s855_s10 = smov 0  }
   0x7   :  { %s857_s11 = smov 0   ;;  %s859_s12 = smov 0  }
   0x8   :  { %s861_s13 = smov 0   ;;  %s863_s14 = smov 0  }
   0x9   :  { %s865_s15 = smov 0   ;;  %s867_s16 = smov 0  }
   0xa LB: > { %1171 = sst [smem:[#allocation11_spill]] %s803_s9  ;;  %s530_s17 = sadd.s32 4294967295, %s831_s16   ;;  %s831_s16 = sphi %s867_s16, %s19_s16   ;;  %s827_s15 = sphi %s865_s15, %s1206_s15   ;;  %s823_s14 = sphi %s863_s14, %s1205_s14   ;;  %s819_s13 = sphi %s861_s13, %s1204_s13   ;;  %s815_s12 = sphi %s859_s12, %s1203_s12   ;;  %s811_s11 = sphi %s857_s11, %s1202_s11   ;;  %s807_s10 = sphi %s855_s10, %s1201_s10   ;;  %s803_s9 = sphi %s853_s9, %s1200_s9  }
   0xb   : > { %s531_s18 = sadd.s32 4294967294, %s831_s16   ;;  %p83_p0 = scmp.ne.s32.totalorder %s807_s10, %s803_s9 }
   0xc   : > { %p897_p1 = scmp.eq.s32.totalorder %s530_s17, 0  ;;  %p117_p2 = scmp.eq.s32.totalorder %s531_s18, 5 }
   0xd   : > { %p532_p4 = scmp.ge.s32.totalorder %s831_s16, 1  ;;  %p124_p6 = scmp.lt.s32.totalorder %s831_s16, 7 }
   0xe   : > { %p903_p3 = por %p897_p1, %p83_p0  ;;  %p908_p5 = por %p117_p2, %p83_p0 }
   0xf   : > { %s1176_s0 = sld [smem:[#allocation15_spill]]  ;;  %p916_p7 = pnand %p532_p4, %p124_p6 }
  0x10   : > { %s1174_s21 = scalar_select %p908_p5, 1, 0 }
  0x11   : > { %p573_p8 = pneg %p916_p7  ;;  %s34_s26 = sadd.s32 1, %s823_s14 }
  0x12   : > { %1175 = sst [smem:[#allocation12_spill]] %s1174_s21  ;;  %s833_s27 = smov [#allocation2]  }
  0x13   : > { %p574_p9 = pnand %p573_p8, %p897_p1  ;;  %p36_p10 = scmp.ge.s32.totalorder %s34_s26, 3 }
  0x14   : > { %s38_s28 = sadd.s32 1, %s827_s15  ;;  %p111_p11 = scmp.eq.s32.totalorder %s530_s17, 5 }
  0x15   : > { %s136_s24 = sshll.u32 %s1176_s0, 4  ;;  %p77_p12 = scmp.ne.s32.totalorder %s811_s11, %s807_s10  ;;  %s137_s24 = int_to_ptr.hbm [resolvable:$true] %s136_s24 }
  0x16   : > { %576 = dma.hbm_to_smem (!%p574_p9), %s137_s24, 64, %s833_s27, [#allocation5]  }
  0x17   : > { %s1208_s26 = smov (%p36_p10, %s34_s26), 0  ;;  %s1210_s28 = smov (!%p36_p10, %s38_s28), %s827_s15 }
  0x18   : > { %1178 = sst [smem:[#allocation13_spill]] %s1208_s26  ;;  %s70_s29 = sadd.s32 1, %s811_s11 }
  0x19   : > { %p78_p13 = scmp.eq.s32.totalorder %s831_s16, 0  ;;  %p40_p0 = scmp.ge.s32.totalorder %s1210_s28, 2 }
  0x1a   : > { %p933_p2 = por %p111_p11, %p77_p12  ;;  %s64_s3 = ssub.s32 %s823_s14, %s1208_s26 }
  0x1b   : > { %p939_p4 = por %p78_p13, %p77_p12  ;;  %s1212_s28 = smov (%p40_p0, %s1210_s28), 0 }
  0x1c   : > { %1181 = sst [smem:[#allocation14_spill]] %s1212_s28  ;;  %p586_p6 = scmp.lt.s32.totalorder %s831_s16, 6 }
  0x1d   : > { %s147_s5 = sand.u32 1, %s811_s11   ;;  %s63_s6 = ssub.s32 %s827_s15, %s1212_s28 }
  0x1e   : > { %s536_s7 = sshll.u32 %s823_s14, 1  ;;  %s65_s8 = sor.u32 %s64_s3, %s63_s6 }
  0x1f   : > { %s535_s17 = sshll.u32 %s147_s5, 4  ;;  %p68_p8 = scmp.eq.s32.totalorder %s65_s8, 0 }
  0x20   : > { %s563_s18 = smul.u32 6, %s827_s15  ;;  %s151_s22 = scalar_lea.vmem [#allocation6], %s535_s17 }
  0x21   : > { %s164_s23 = sshll.u32 %s151_s22, 4  ;;  %p578_p9 = pnand %p586_p6, %p939_p4  ;;  %s165_s23 = int_to_ptr.vmem [resolvable:$true] %s164_s23 }
  0x22   : > { %s952_s24 = scalar_select %p68_p8, %s811_s11, %s70_s29  }
  0x23   : > { %s158_s27 = sadd.s32 %s563_s18, %s536_s7  ;;  %s148_s3 = scalar_lea.sflag [#allocation3], %s147_s5 }
  0x24   : > { %s537_s0 = sshll.u32 %s158_s27, 3  ;;  %173 = sbr.rel (%p916_p7) target bundleno = 102 (0x66), region = 28 }
  0x25   : > { %s160_s9 = scalar_lea.hbm %s1164_s1, %s537_s0 }
  0x26   : > { %s162_s28 = sshll.u32 %s160_s9, 4  ;;  %s163_s28 = int_to_ptr.hbm [resolvable:$true] %s162_s28 }
  0x27   : > { %580 = dma.hbm_to_vmem [thread:$0]  (!%p578_p9), %s163_s28, 256, %s165_s23, %s148_s3  }
  0x29   : > { %790 = dma.done.wait (%p897_p1), [#allocation5], 64  }
  0x2a   : > { %792 = vsyncadd (%p897_p1), [#allocation5], 4294967232  ;;  %s968_s29 = sand.u32 1, %s807_s10  }
  0x2b   : > { %s540_s0 = sshll.u32 %s968_s29, 4  ;;  %s181_s9 = scalar_lea.sflag [#allocation3], %s968_s29 }
  0x2c   : > { %s974_s21 = scalar_lea.vmem [#allocation6], %s540_s0 }
  0x2d   : > { %794 = dma.done.wait (%p903_p3), %s181_s9, 256  }
  0x2e   : > { %796 = vsyncadd (%p903_p3), %s181_s9, 4294967040 }
  0x2f   : > { %190 = sfence }
  0x30   : > { %v216_v0 = vlaneseq  ;;  %v239_v1 = vld [vmem:[%s974_s21] ss:$8 sm:$0x3]  ;;  %v834_v2 = vmov 16.0   ;;  %s983_s19 = sshll.u32 %s815_s12, 7  ;;  %vm264_vm5 = vcmask 1040384  }
  0x31   : > { %658 = vrcp.f32 %v834_v2  ;;  %v544_v3 = vmul.f32 -1.442695, %v239_v1  ;;  %v543_v4 = vld [vmem:[%s974_s21 + $0x1] ss:$8 sm:$0x3]  ;;  %s211_s20 = sadd.s32 1, %s983_s19 }
  0x32   : > { %v545_v5 = vmul.f32 -1.442695, %v543_v4  ;;  %v986_v6 = vand.u32 127, %v216_v0  ;;  %v547_v7 = vld [vmem:[%s974_s21 + $0x2] ss:$8 sm:$0x3] }
  0x33   : > { %660 = vpow2.f32 %v544_v3  ;;  %s989_s25 = sld [smem:[#allocation2 + %s211_s20]]  ;;  %v306_v8 = vmul.f32 1.442695, %v547_v7  ;;  %v548_v9 = vld [vmem:[%s974_s21 + $0x3] ss:$8 sm:$0x3] }
  0x34   : > { %662 = vpow2.f32 %v545_v5  ;;  %s993_s26 = sld [smem:[#allocation2 + %s983_s19]]  ;;  %v312_v10 = vmul.f32 1.442695, %v548_v9  ;;  %v996_v11 = vld [vmem:[%s974_s21 + $0x4] ss:$8 sm:$0x3]  ;;  %v222_v23 = vcvt.s32.f32 %v986_v6 }
  0x35   : > { %664 = vpow2.f32 %v306_v8  ;;  %v999_v12 = vand.u32 2147483647, %v996_v11  ;;  %v1002_v14 = vadd.s32 128, %v986_v6  ;;  %vm1007_vm0 = vcmp.lt.s32.totalorder %v216_v0, 256  ;;  %v361_v22 = vld [vmem:[%s974_s21] sm:$0xe0] }
  0x36   : > { %666 = vpow2.f32 %v312_v10  ;;  %v362_v26 = vld [vmem:[%s974_s21 + $0x8] sm:$0xe0]  ;;  %v556_v33 = vmul.f32 -1.442695, %v361_v22  ;;  %s1029_s28 = scalar_lea.vmem [#allocation7], %s540_s0  ;;  %vm835_vm7 = vmmov 1  }
  0x37   : > { %v659_v13 = vpop.eup %658  ;;  %v333_v17 = vmax.f32 %v999_v12, 1e-30  ;;  %v335_v25 = vadd.f32 1.0, %v999_v12  ;;  %v223_v28 = vcvt.s32.f32 %v1002_v14  ;;  %vm329_vm2 = vcmp.gt.f32.partialorder %v999_v12, 2.4142137  ;;  %s564_s4 = smul.u32 6, %s819_s13 }
  0x38   : > { %v225_v15 = vmul.f32 16.0, %v659_v13  ;;  %vm229_vm1 = vweird.f32 %v659_v13  ;;  %v557_v35 = vmul.f32 -1.442695, %v362_v26  ;;  %vm330_vm3 = vcmp.gt.f32.partialorder %v999_v12, 0.41421357  ;;  %vm1039_vm8 = vmxor %vm329_vm2, %vm835_vm7  ;;  %s559_s5 = sshll.u32 %s815_s12, 1 }
  0x39   : > { %v661_v16 = vpop.eup %660  ;;  %668 = vrcp.f32 %v333_v17  ;;  %v314_v30 = vstv %s989_s25  ;;  %v552_v40 = vadd.f32 -1.0, %v999_v12  ;;  %vm1054_vm11 = vmand %vm330_vm3, %vm1039_vm8  ;;  %s213_s6 = sadd.s32 2, %s983_s19  ;;  %s417_s13 = sadd.s32 %s564_s4, %s559_s5 }
  0x3a   : > { %v663_v18 = vpop.eup %662  ;;  %v226_v19 = vsub.f32 1.0, %v225_v15  ;;  %v1005_v20 = vadd.f32 1.0, %v661_v16  ;;  %v308_v32 = vstv %s993_s26  ;;  %s214_s7 = sld [smem:[#allocation2 + %s213_s6]]  ;;  %s560_s12 = sshll.u32 %s417_s13, 3 }
  0x3b   : > { %v1013_v24 = vadd.f32 1.0, %v663_v18  ;;  %v665_v27 = vpop.eup %664  ;;  %s419_s18 = scalar_lea.hbm %s1165_s2, %s560_s12  ;;  %s421_s22 = sshll.u32 %s1029_s28, 4  ;;  %s422_s22 = int_to_ptr.vmem [resolvable:$true] %s421_s22 }
  0x3c   : > { %v227_v29 = vmul.f32 %v659_v13, %v226_v19  ;;  %670 = vrcp.f32 %v1005_v20  ;;  %v667_v31 = vpop.eup %666  ;;  %v255_v36 = vand.u32 2147483647, %v1005_v20  ;;  %vm251_vm4 = vweird.f32 %v1005_v20  ;;  %s423_s23 = sshll.u32 %s419_s18, 4  ;;  %s404_s27 = scalar_lea.sflag [#allocation4], %s968_s29  ;;  %s424_s23 = int_to_ptr.hbm [resolvable:$true] %s423_s23 }
  0x3d   : > { %672 = vrcp.f32 %v1013_v24  ;;  %v315_v37 = vmul.f32 %v667_v31, %v314_v30  ;;  %v309_v39 = vmul.f32 %v665_v27, %v308_v32  ;;  %v257_v46 = vand.u32 2147483648, %v1005_v20  ;;  %s743_s3 = sshra.s32 %s424_s23, 4  ;;  %s749_s19 = scalar_lea.hbm %s1165_s2, 96  ;;  %s744_s3 = int_to_ptr.hbm [resolvable:$true] %s743_s3 }
  0x3e   : > { %v228_v34 = vadd.f32 %v659_v13, %v227_v29  ;;  %674 = vrcp.f32 %v335_v25  ;;  %vm284_vm6 = vweird.f32 %v1013_v24  ;;  %v288_v47 = vand.u32 2147483647, %v1013_v24  ;;  %s745_s0 = scalar_lea.hbm %s744_s3, 16  ;;  %p750_p10 = scmp.lt.s32.totalorder %s744_s3, %s1165_s2 }
  0x3f   : > { %v669_v41 = vpop.eup %668  ;;  %v316_v44 = vmul.f32 0.5, %v315_v37  ;;  %550 = vst.msk [vmem:[%s1029_s28 + $0x3] ss:$8 sm:$0x3] %vm1007_vm0, %v315_v37  ;;  %676 = vpow2.f32 %v556_v33  ;;  %vm1044_vm9 = vcmp.eq.f32.partialorder %v255_v36, 8.507059e+37  ;;  %v290_v55 = vand.u32 2147483648, %v1013_v24  ;;  %p746_p1 = scmp.ne.s32.totalorder %s744_s3, %s745_s0  ;;  %p751_p11 = scmp.lt.s32.totalorder %s749_s19, %s745_s0 }
  0x40   : > { %v230_v38 = vsel %vm229_vm1, %v659_v13, %v228_v34  ;;  %678 = vpow2.f32 %v557_v35  ;;  %v337_v57 = vsub.f32 0.0, %v669_v41  ;;  %v258_v63 = vor.u32 1.1754944e-38, %v257_v46 }
  0x41   : > { %v231_v42 = vmul.f32 %v230_v38, %v222_v23  ;;  %v232_v43 = vmul.f32 %v230_v38, %v223_v28  ;;  %v317_v56 = vsub.f32 %v309_v39, %v316_v44  ;;  %v291_v10 = vor.u32 1.1754944e-38, %v290_v55  ;;  %p747_p3 = pnand %p746_p1, %p933_p2  ;;  %p752_p12 = por %p751_p11, %p750_p10 }
  0x42   : > { %v671_v45 = vpop.eup %670  ;;  %vm289_vm15 = vcmp.eq.f32.partialorder %v288_v47, 8.507059e+37 }
  0x43   : > { %v673_v49 = vpop.eup %672  ;;  %v233_v50 = vfloor.f32 %v231_v42  ;;  %v234_v51 = vfloor.f32 %v232_v43  ;;  %v247_v52 = vmul.f32 %v671_v45, %v1005_v20  ;;  %vm252_vm10 = vweird.f32 %v671_v45  ;;  %549 = vst.msk [vmem:[%s1029_s28 + $0x2] ss:$8 sm:$0x3] %vm1007_vm0, %v317_v56  ;;  %p748_p7 = pneg %p747_p3 }
  0x44   : > { %v280_v54 = vmul.f32 %v673_v49, %v1013_v24  ;;  %v675_v58 = vpop.eup %674  ;;  %vm285_vm12 = vweird.f32 %v673_v49  ;;  %vm1063_vm13 = vmor %vm251_vm4, %vm252_vm10  ;;  %vm326_vm10 = vcmp.ge.f32.partialorder %v996_v11, 0.0 }
  0x45   : > { %v235_v59 = vmul.f32 16.0, %v233_v50  ;;  %v236_v60 = vmul.f32 16.0, %v234_v51  ;;  %v248_v61 = vsub.f32 1.0, %v247_v52  ;;  %v339_v1 = vmul.f32 %v675_v58, %v552_v40  ;;  %v677_v2 = vpop.eup %676  ;;  %vm1073_vm14 = vmor %vm284_vm6, %vm285_vm12  ;;  %p753_p13 = pnand %p752_p12, %p748_p7 }
  0x46   : > { %v281_v0 = vsub.f32 1.0, %v280_v54  ;;  %v296_v6 = vrot.slane %v234_v51, 7  ;;  %v679_v7 = vpop.eup %678  ;;  %v369_v14 = vadd.f32 1.0, %v677_v2  ;;  %v836_v54 = vmov 0.0  }
  0x47   : > { %v237_v3 = vsub.f32 %v222_v23, %v235_v59  ;;  %v238_v4 = vsub.f32 %v223_v28, %v236_v60  ;;  %v249_v5 = vmul.f32 %v671_v45, %v248_v61  ;;  %v340_v13 = vsel %vm1054_vm11, %v339_v1, %v999_v12 }
  0x48   : > { %v282_v9 = vmul.f32 %v673_v49, %v281_v0  ;;  %v1079_v18 = vsel %vm329_vm2, %v337_v57, %v340_v13  ;;  %v370_v19 = vadd.f32 1.0, %v679_v7  ;;  %680 = vrcp.f32 %v369_v14 }
  0x49   : > { %v250_v15 = vadd.f32 %v671_v45, %v249_v5  ;;  %v263_v16 = vrot.slane %v238_v4, 7  ;;  %v344_v22 = vmul.f32 %v1079_v18, %v1079_v18  ;;  %v297_v25 = vsel %vm264_vm5, %v233_v50, %v296_v6 }
  0x4a   : > { %v283_v20 = vadd.f32 %v673_v49, %v282_v9  ;;  %682 = vrcp.f32 %v370_v19  ;;  %vm376_vm1 = vweird.f32 %v369_v14  ;;  %v382_v40 = vand.u32 2147483648, %v369_v14 }
  0x4b   : > { %v254_v23 = vsel %vm1063_vm13, %v671_v45, %v250_v15  ;;  %v265_v24 = vsel %vm264_vm5, %v237_v3, %v263_v16  ;;  %v345_v28 = vmul.f32 0.080537446, %v344_v22  ;;  %v380_v42 = vand.u32 2147483647, %v369_v14 }
  0x4c   : > { %v259_v26 = vsel %vm1044_vm9, %v258_v63, %v254_v23  ;;  %v287_v27 = vsel %vm1073_vm14, %v673_v49, %v283_v20  ;;  %vm391_vm4 = vweird.f32 %v370_v19  ;;  %v397_v45 = vand.u32 2147483648, %v370_v19 }
  0x4d   : > { %v267_v29 = vadd.f32 %v265_v24, %v259_v26  ;;  %v292_v30 = vsel %vm289_vm15, %v291_v10, %v287_v27  ;;  %v553_v32 = vadd.f32 -0.13877685, %v345_v28  ;;  %v395_v48 = vand.u32 2147483647, %v370_v19 }
  0x4e   : > { %v299_v31 = vadd.f32 %v297_v25, %v292_v30  ;;  %v681_v34 = vpop.eup %680  ;;  %v383_v51 = vor.u32 1.1754944e-38, %v382_v40  ;;  %vm381_vm7 = vcmp.eq.f32.partialorder %v380_v42, 8.507059e+37  ;;  %v342_v55 = vsel %vm1054_vm11, 0.7853982, %v836_v54 }
  0x4f   : > { %v268_v33 = vmul.f32 16.0, %v267_v29  ;;  %v347_v36 = vmul.f32 %v553_v32, %v344_v22  ;;  %v372_v37 = vmul.f32 %v681_v34, %v369_v14  ;;  %vm377_vm3 = vweird.f32 %v681_v34 }
  0x50   : > { %v300_v35 = vmul.f32 16.0, %v299_v31  ;;  %v683_v38 = vpop.eup %682  ;;  %vm1101_vm6 = vmor %vm376_vm1, %vm377_vm3  ;;  %v398_v57 = vor.u32 1.1754944e-38, %v397_v45  ;;  %vm396_vm9 = vcmp.eq.f32.partialorder %v395_v48, 8.507059e+37  ;;  %v343_v62 = vsel %vm329_vm2, 1.5707964, %v342_v55 }
  0x51   : > { %273 = vst.msk [vmem:[%s1029_s28] ss:$8 sm:$0x3] %vm1007_vm0, %v268_v33  ;;  %v348_v39 = vadd.f32 0.19977711, %v347_v36  ;;  %v373_v41 = vsub.f32 1.0, %v372_v37  ;;  %v387_v43 = vmul.f32 %v683_v38, %v370_v19  ;;  %vm392_vm5 = vweird.f32 %v683_v38 }
  0x52   : > { %546 = vst.msk [vmem:[%s1029_s28 + $0x1] ss:$8 sm:$0x3] %vm1007_vm0, %v300_v35  ;;  %vm393_vm8 = vmor %vm391_vm4, %vm392_vm5  ;;  %v837_v2 = vmov -1.0   ;;  %v356_v4 = vstv %s214_s7 }
  0x53   : > { %v349_v44 = vmul.f32 %v348_v39, %v344_v22  ;;  %v374_v46 = vmul.f32 %v681_v34, %v373_v41  ;;  %v388_v47 = vsub.f32 1.0, %v387_v43  ;;  %v327_v3 = vsel %vm326_vm10, 1.0, %v837_v2 }
  0x55   : > { %v554_v49 = vadd.f32 -0.3333295, %v349_v44  ;;  %v375_v52 = vadd.f32 %v681_v34, %v374_v46  ;;  %v389_v53 = vmul.f32 %v683_v38, %v388_v47 }
  0x57   : > { %v351_v56 = vmul.f32 %v554_v49, %v344_v22  ;;  %v379_v58 = vsel %vm1101_vm6, %v681_v34, %v375_v52  ;;  %v390_v59 = vadd.f32 %v683_v38, %v389_v53 }
  0x58   : > { %v384_v61 = vsel %vm381_vm7, %v383_v51, %v379_v58 }
  0x59   : > { %v352_v60 = vmul.f32 %v351_v56, %v1079_v18  ;;  %401 = vst [vmem:[%s1029_s28] sm:$0xe0] %v384_v61  ;;  %v394_v63 = vsel %vm393_vm8, %v683_v38, %v390_v59 }
  0x5a   : > { %v399_v1 = vsel %vm396_vm9, %v398_v57, %v394_v63 }
  0x5b   : > { %v353_v0 = vadd.f32 %v352_v60, %v1079_v18  ;;  %402 = vst [vmem:[%s1029_s28 + $0x8] sm:$0xe0] %v399_v1 }
  0x5d   : > { %v354_v11 = vadd.f32 %v353_v0, %v343_v62 }
  0x5f   : > { %v355_v12 = vmul.f32 %v354_v11, %v327_v3 }
  0x61   : > { %v357_v5 = vadd.f32 %v356_v4, %v355_v12 }
  0x63   : > { %555 = vst.msk [vmem:[%s1029_s28 + $0x4] ss:$8 sm:$0x3] %vm1007_vm0, %v357_v5 }
  0x64   : > { %756 = shalt.err (!%p753_p13)
}
  0x65   : > { %571 = dma.vmem_to_hbm [thread:$0]  (%p933_p2), %s422_s22, 256, %s424_s23, %s404_s27  }
  0x66 PF: > { %s1196_s29 = sld [smem:[#allocation11_spill]]  ;;  %p588_p0 = scmp.ge.s32.totalorder %s831_s16, 2 }
  0x68   : > { %p582_p4 = pnand %p588_p0, %p908_p5 }
  0x6a   : > { %p583_p6 = pneg %p582_p4 }
  0x6c   : > { %s435_s28 = sand.u32 1, %s1196_s29  }
  0x6d   : > { %s436_s4 = scalar_lea.sflag [#allocation4], %s435_s28 }
  0x6e   : > { %798 = dma.done.wait (%p583_p6), %s436_s4, 256  }
  0x6f   : > { %800 = vsyncadd (%p583_p6), %s436_s4, 4294967040  ;;  %s19_s16 = sadd.s32 1, %s831_s16   ;;  %s1198_s30 = sld [smem:[#allocation13_spill]] }
  0x70   : > { %p16_p8 = scmp.ge.s32.totalorder %s19_s16, 8   ;;  %s1199_s5 = sld [smem:[#allocation14_spill]] }
  0x71   : > { %s1200_s9 = smov %s807_s10  ;;  %s1201_s10 = smov %s811_s11 }
  0x72   : > { %s1202_s11 = smov %s952_s24  ;;  %s1203_s12 = smov %s823_s14 }
  0x73   : > { %s1204_s13 = smov %s827_s15  ;;  %18 = sbr.rel (!%p16_p8) target bundleno = 10 (0xa), region = 86 }
  0x75   : > { %s1205_s14 = smov %s1198_s30 }
  0x76   : > { %s1206_s15 = smov %s1199_s5 }
  0x78   :  { %442 = vsyncpa [#allocation3], 1 }
  0x79   :  { %444 = vsyncpa [#allocation3 + $0x1], 1 }
  0x7a   :  { %445 = vsyncpa [#allocation4], 1 }
  0x7b   :  { %447 = vsyncpa [#allocation4 + $0x1], 1 }
  0x7c   :  { %448 = vsyncpa [#allocation5], 1 }
  0x7d   :  { %450 = vsyncpa [#allocation5 + $0x1], 1 }

</bundles_post_ra>
